<compile_context>
chip_gen: v6e
topology: v6e:2x2x1
jax: 0.10.0
libtpu: 0.0.40
codegen_flags: <defaults>
</compile_context>

<pallas_src>
import math
import functools

import jax
import jax.numpy as jnp
from jax.experimental import pallas as pl
from jax.experimental.pallas import tpu as pltpu


# ---------------------------------------------------------------------------
# Capability probes (construction-time only; real lowering errors from the
# pallas_calls themselves are NOT swallowed anywhere).
# ---------------------------------------------------------------------------
def _buffered_supported():
    try:
        pl.BlockSpec((8, 128), lambda i: (0, 0), pipeline_mode=pl.Buffered(1))
        return True
    except (TypeError, AttributeError):
        return False


_WEIGHT_SINGLE_BUFFER = _buffered_supported()


def _vmem_limit_bytes():
    """Generation-aware VMEM budget: ~3/4 of physical capacity, capped at
    112 MiB (=> ~48 MiB on v7x's 64 MiB VMEM, ~96 MiB on v5e/v6e's 128 MiB).
    Falls back to the v7x-safe 48 MiB if the hardware query is unavailable."""
    try:
        cap = int(pltpu.get_tpu_info().vmem_capacity_bytes)
    except Exception:  # hardware-capability probe only
        return 48 * 1024 * 1024
    return int(min(cap * 3 // 4, 112 * 1024 * 1024))


def _pick_tile(dim, target):
    """Largest tile <= target that divides dim and is a multiple of 8
    (falls back to the full dim)."""
    if dim <= target:
        return dim
    t = (target // 8) * 8
    while t >= 8:
        if dim % t == 0:
            return t
        t -= 8
    return dim


def _const_spec(shape, grid_rank):
    """BlockSpec for a grid-invariant (weight) operand; single-buffered when
    pipeline_mode is supported (weights never change across grid steps)."""
    nd = len(shape)
    if grid_rank == 2:
        index_map = lambda b, s, _n=nd: (0,) * _n
    else:
        index_map = lambda b, q, k, _n=nd: (0,) * _n
    if _WEIGHT_SINGLE_BUFFER:
        return pl.BlockSpec(shape, index_map, pipeline_mode=pl.Buffered(1))
    return pl.BlockSpec(shape, index_map)


# ---------------------------------------------------------------------------
# In-kernel math helpers (traced inside kernel bodies, all f32)
# ---------------------------------------------------------------------------
def _layernorm(x, gamma, beta, eps):
    mu = jnp.mean(x, axis=-1, keepdims=True)
    var = jnp.mean((x - mu) ** 2, axis=-1, keepdims=True)
    return (x - mu) * jax.lax.rsqrt(var + eps) * gamma + beta


def _gelu_new(x):
    # 0.5 * x * (1 + tanh(sqrt(2/pi) * (x + 0.044715 * x^3)))
    return 0.5 * x * (1.0 + jnp.tanh(
        math.sqrt(2.0 / math.pi) * (x + 0.044715 * (x * x * x))))


# ---------------------------------------------------------------------------
# Kernel A: QKV projection + one-time head split.
#   grid = (B, n_s_tiles), both "parallel".
#   Outputs Q, K, V in (B, n_head, S, hd) so the flash kernel never transposes.
#   Q is pre-scaled by 1/sqrt(hd)  (equivalent to dividing the scores).
# ---------------------------------------------------------------------------
def qkv_proj_kernel(x_ref, w_ref, b_ref, q_ref, k_ref, v_ref,
                    *, n_head, inv_sqrt_hd):
    ts, C = x_ref.shape[1], x_ref.shape[2]
    hd = C // n_head
    cdt = w_ref.dtype
    x = x_ref[0].astype(cdt)                                    # (ts, C)

    def proj(col0, scale):
        # three separate matmuls against static, lane-aligned weight column
        # slices (no (ts, 3C) intermediate), f32 accumulation on the MXU.
        y = jnp.dot(x, w_ref[:, col0:col0 + C],
                    preferred_element_type=jnp.float32) + b_ref[0, col0:col0 + C]
        if scale != 1.0:
            y = y * jnp.float32(scale)
        # Head-split relayout happens exactly once per token, here, outside
        # the flash loop (keeps XLU transposes away from the attention MXU).
        return y.reshape(ts, n_head, hd).transpose(1, 0, 2)     # (H, ts, hd)

    q_ref[0] = proj(0, inv_sqrt_hd).astype(q_ref.dtype)
    k_ref[0] = proj(C, 1.0).astype(k_ref.dtype)
    v_ref[0] = proj(2 * C, 1.0).astype(v_ref.dtype)


# ---------------------------------------------------------------------------
# Kernel B: flash attention + out-proj + LN1 + MLP + LN2, fused.
#   grid = (B, n_q, n_kv), semantics ("parallel", "parallel", "arbitrary").
#   Online-softmax stats (m, l) and the per-head context accumulator persist
#   in VMEM scratch across the KV axis; the epilogue (out-proj, LayerNorms,
#   MLP) runs on the last KV step.
# ---------------------------------------------------------------------------
def block_kernel(x_ref, q_ref, k_ref, v_ref, mask_ref,
                 cpw_ref, cpb_ref, ln1g_ref, ln1b_ref,
                 fcw_ref, fcb_ref, pw_ref, pb_ref, ln2g_ref, ln2b_ref,
                 out_ref,
                 m_scr, l_scr, acc_scr,
                 *, n_head, eps, tq, tkv, approx_recip):
    qi = pl.program_id(1)
    kvi = pl.program_id(2)
    n_kv = pl.num_programs(2)
    q_start = qi * tq
    kv_start = kvi * tkv

    @pl.when(kvi == 0)
    def _init():
        m_scr[...] = jnp.full(m_scr.shape, -jnp.inf, jnp.float32)
        l_scr[...] = jnp.zeros(l_scr.shape, jnp.float32)
        acc_scr[...] = jnp.zeros(acc_scr.shape, jnp.float32)

    # Causal tile skip: a KV tile entirely above this q-tile's diagonal gets
    # score -10000 (+mask) everywhere; with at least one visible in-range key
    # its softmax weight underflows to exactly 0 in f32, so skip its matmuls
    # and exps entirely.
    @pl.when(kv_start < q_start + tq)
    def _compute():
        q = q_ref[0]                       # (H, tq, hd)  pre-scaled by 1/sqrt(hd)
        k = k_ref[0]                       # (H, tkv, hd)
        v = v_ref[0]                       # (H, tkv, hd)

        # scores, head-batched (leading batch dim -> no relayout)
        s = jnp.einsum('hqd,hkd->hqk', q, k,
                       preferred_element_type=jnp.float32)      # (H, tq, tkv) f32

        # causal mask (single select; identical to w*b + (-1e4)*(1-b))
        row = q_start + jax.lax.broadcasted_iota(jnp.int32, (tq, tkv), 0)
        col = kv_start + jax.lax.broadcasted_iota(jnp.int32, (tq, tkv), 1)
        s = jnp.where((col <= row)[None, :, :], s, jnp.float32(-10000.0))

        # additive attention mask; full (1,1,S) row is resident, slice the
        # current KV window dynamically (avoids a sub-128 lane block spec).
        off = pl.multiple_of(kv_start, tkv)
        amask = mask_ref[0, 0, pl.ds(off, tkv)].astype(jnp.float32)   # (tkv,)
        s = s + amask[None, None, :]

        # online softmax update (f32)
        m_prev = m_scr[...]                                     # (H, tq, 1)
        m_new = jnp.maximum(m_prev, jnp.max(s, axis=-1, keepdims=True))
        alpha = jnp.exp(m_prev - m_new)
        p = jnp.exp(s - m_new)
        l_scr[...] = alpha * l_scr[...] + jnp.sum(p, axis=-1, keepdims=True)
        pv = jnp.einsum('hqk,hkd->hqd', p.astype(v.dtype), v,
                        preferred_element_type=jnp.float32)     # (H, tq, hd)
        acc_scr[...] = alpha * acc_scr[...] + pv
        m_scr[...] = m_new
        # attn_dropout: identity (eval mode)

    @pl.when(kvi == n_kv - 1)
    def _epilogue():
        cdt = cpw_ref.dtype
        x = x_ref[0].astype(jnp.float32)                        # (tq, C)

        # NOTE: approx reciprocal (EUP) only in the bf16 path; softmax rows
        # then sum to 1 only approximately (well below bf16 rounding).
        inv_l = pl.reciprocal(l_scr[...], approx=approx_recip)  # (H, tq, 1)
        ctx = (acc_scr[...] * inv_l).astype(cdt)                # (H, tq, hd)

        # Fused head-merge + output projection, transpose-free:
        #   a[q, c] = sum_h sum_d ctx[h, q, d] * Wproj[h*hd + d, c]
        a = jnp.einsum('hqd,hdc->hqc', ctx, cpw_ref[...],
                       preferred_element_type=jnp.float32)      # (H, tq, C)
        a = jnp.sum(a, axis=0) + cpb_ref[0]                     # (tq, C)
        # resid_dropout: identity (eval mode)

        n = _layernorm(x + a, ln1g_ref[0], ln1b_ref[0], eps)

        h1 = _gelu_new(jnp.dot(n.astype(cdt), fcw_ref[...],
                               preferred_element_type=jnp.float32) + fcb_ref[0])
        m = jnp.dot(h1.astype(cdt), pw_ref[...],
                    preferred_element_type=jnp.float32) + pb_ref[0]
        # mlp dropout: identity (eval mode)

        out_ref[0] = _layernorm(n + m, ln2g_ref[0], ln2b_ref[0],
                                eps).astype(out_ref.dtype)


# ---------------------------------------------------------------------------
# Wrapper
# ---------------------------------------------------------------------------
def gpt_block(x, attention_mask, params, *, n_head, eps=1e-5,
              compute_dtype=jnp.bfloat16, out_dtype=None,
              q_tile=256, kv_tile=256, proj_tile=256):
    B, S, C = x.shape
    assert C % n_head == 0, "n_embd must be divisible by n_head"
    assert attention_mask.shape == (B, 1, S)
    hd = C // n_head
    if out_dtype is None:
        out_dtype = x.dtype

    # v5e note: default tiles (256) keep the matmul M dimension >= 128.
    tq = _pick_tile(S, q_tile)
    tkv = _pick_tile(S, kv_tile)
    ts = _pick_tile(S, proj_tile)
    n_q, n_kv, n_s = S // tq, S // tkv, S // ts

    vmem_limit = _vmem_limit_bytes()
    cdt = compute_dtype
    cbytes = jnp.dtype(cdt).itemsize

    # Matmul weights in the MXU operand dtype (bf16 halves weight DMA/VMEM);
    # biases and LayerNorm affine params stay f32.
    caw = params['c_attn_w'].astype(cdt)                         # (C, 3C)
    cab = params['c_attn_b'].astype(jnp.float32)                 # (1, 3C)
    cpw = params['c_proj_w'].astype(cdt).reshape(n_head, hd, C)  # head-batched view
    cpb = params['c_proj_b'].astype(jnp.float32)
    ln1g = params['ln1_g'].astype(jnp.float32)
    ln1b = params['ln1_b'].astype(jnp.float32)
    fcw = params['fc_w'].astype(cdt)
    fcb = params['fc_b'].astype(jnp.float32)
    pw = params['mlp_proj_w'].astype(cdt)
    pb = params['mlp_proj_b'].astype(jnp.float32)
    ln2g = params['ln2_g'].astype(jnp.float32)
    ln2b = params['ln2_b'].astype(jnp.float32)

    # ================= Kernel A: QKV projection + head split ================
    qkv_kernel = functools.partial(qkv_proj_kernel, n_head=n_head,
                                   inv_sqrt_hd=float(1.0 / math.sqrt(hd)))
    qkv_shape = jax.ShapeDtypeStruct((B, n_head, S, hd), cdt)
    cost_a = pl.CostEstimate(
        flops=2 * B * S * C * 3 * C,
        transcendentals=0,
        bytes_accessed=B * S * C * 4 + C * 3 * C * cbytes + 3 * C * 4
                       + 3 * B * S * C * cbytes)

    q4, k4, v4 = pl.pallas_call(
        qkv_kernel,
        out_shape=(qkv_shape, qkv_shape, qkv_shape),
        grid=(B, n_s),
        in_specs=[pl.BlockSpec((1, ts, C), lambda b, s: (b, s, 0)),
                  _const_spec((C, 3 * C), 2),
                  _const_spec((1, 3 * C), 2)],
        out_specs=[pl.BlockSpec((1, n_head, ts, hd), lambda b, s: (b, 0, s, 0)),
                   pl.BlockSpec((1, n_head, ts, hd), lambda b, s: (b, 0, s, 0)),
                   pl.BlockSpec((1, n_head, ts, hd), lambda b, s: (b, 0, s, 0))],
        compiler_params=pltpu.CompilerParams(
            dimension_semantics=("parallel", "parallel"),
            vmem_limit_bytes=vmem_limit),
        cost_estimate=cost_a,
    )(x, caw, cab)

    # ============ Kernel B: flash attention + out-proj + LN + MLP ===========
    blk_kernel = functools.partial(
        block_kernel, n_head=n_head, eps=eps, tq=tq, tkv=tkv,
        approx_recip=(compute_dtype != jnp.float32))

    w_b_bytes = (C * C + C * 4 * C + 4 * C * C) * cbytes + 8 * C * 4
    cost_b = pl.CostEstimate(
        flops=B * (4 * S * S * C + 2 * S * C * C + 16 * S * C * C),
        transcendentals=B * (n_head * S * S + 4 * S * C),
        bytes_accessed=B * S * C * 4                      # x (residual)
                       + B * S * C * cbytes               # q
                       + 2 * n_q * B * S * C * cbytes     # k, v re-read per q tile
                       + B * S * 4 + w_b_bytes
                       + B * S * C * jnp.dtype(out_dtype).itemsize)

    out = pl.pallas_call(
        blk_kernel,
        out_shape=jax.ShapeDtypeStruct((B, S, C), out_dtype),
        grid=(B, n_q, n_kv),
        in_specs=[
            pl.BlockSpec((1, tq, C), lambda b, q, k: (b, q, 0)),           # x
            pl.BlockSpec((1, n_head, tq, hd), lambda b, q, k: (b, 0, q, 0)),   # q
            pl.BlockSpec((1, n_head, tkv, hd), lambda b, q, k: (b, 0, k, 0)),  # k
            pl.BlockSpec((1, n_head, tkv, hd), lambda b, q, k: (b, 0, k, 0)),  # v
            pl.BlockSpec((1, 1, S), lambda b, q, k: (b, 0, 0)),            # mask row
            _const_spec((n_head, hd, C), 3),                               # c_proj_w
            _const_spec((1, C), 3),                                        # c_proj_b
            _const_spec((1, C), 3), _const_spec((1, C), 3),                # ln_1 g,b
            _const_spec((C, 4 * C), 3), _const_spec((1, 4 * C), 3),        # c_fc
            _const_spec((4 * C, C), 3), _const_spec((1, C), 3),            # mlp proj
            _const_spec((1, C), 3), _const_spec((1, C), 3),                # ln_2 g,b
        ],
        out_specs=pl.BlockSpec((1, tq, C), lambda b, q, k: (b, q, 0)),
        scratch_shapes=[pltpu.VMEM((n_head, tq, 1), jnp.float32),   # running max
                        pltpu.VMEM((n_head, tq, 1), jnp.float32),   # denominator
                        pltpu.VMEM((n_head, tq, hd), jnp.float32)], # context acc
        compiler_params=pltpu.CompilerParams(
            dimension_semantics=("parallel", "parallel", "arbitrary"),
            vmem_limit_bytes=vmem_limit),
        cost_estimate=cost_b,
    )(x, q4, k4, v4, attention_mask,
      cpw, cpb, ln1g, ln1b, fcw, fcb, pw, pb, ln2g, ln2b)
    return out


# ---------------------------------------------------------------------------
# Plain-JAX reference (mirrors the PyTorch module exactly) for verification
# ---------------------------------------------------------------------------
def gpt_block_ref(x, attention_mask, params, *, n_head, eps=1e-5):
    B, S, C = x.shape
    hd = C // n_head

    def ln(v, g, b):
        mu = jnp.mean(v, -1, keepdims=True)
        var = jnp.mean((v - mu) ** 2, -1, keepdims=True)
        return (v - mu) / jnp.sqrt(var + eps) * g[0] + b[0]

    qkv = x @ params['c_attn_w'] + params['c_attn_b'][0]
    q, k, v = jnp.split(qkv, 3, axis=-1)
    q = q.reshape(B, S, n_head, hd).transpose(0, 2, 1, 3)
    k = k.reshape(B, S, n_head, hd).transpose(0, 2, 3, 1)
    v = v.reshape(B, S, n_head, hd).transpose(0, 2, 1, 3)
    w = (q @ k) / math.sqrt(hd)
    bias = jnp.tril(jnp.ones((S, S), jnp.float32))[None, None]
    w = w * bias + (-10000.0) * (1.0 - bias)
    w = w + attention_mask[:, None, :, :]
    w = jax.nn.softmax(w, axis=-1)
    a = (w @ v).transpose(0, 2, 1, 3).reshape(B, S, C)
    a = a @ params['c_proj_w'] + params['c_proj_b'][0]
    n = ln(x + a, params['ln1_g'], params['ln1_b'])
    h1 = _gelu_new(n @ params['fc_w'] + params['fc_b'][0])
    m = h1 @ params['mlp_proj_w'] + params['mlp_proj_b'][0]
    return ln(n + m, params['ln2_g'], params['ln2_b'])


# ---------------------------------------------------------------------------
if __name__ == "__main__":
    # small config consistent with the module: n_embd=32, n_head=4, n_ctx=16
    B, S, C, NH = 2, 16, 32, 4
    EPS = 1e-5

    ks = jax.random.split(jax.random.PRNGKey(0), 14)

    def w(k, shape, std=0.02):
        return (std * jax.random.normal(k, shape)).astype(jnp.float32)

    params = {
        'c_attn_w':   w(ks[0], (C, 3 * C)),
        'c_attn_b':   w(ks[1], (1, 3 * C)),
        'c_proj_w':   w(ks[2], (C, C)),
        'c_proj_b':   w(ks[3], (1, C)),
        'ln1_g':      (1.0 + 0.1 * jax.random.normal(ks[4], (1, C))).astype(jnp.float32),
        'ln1_b':      w(ks[5], (1, C), std=0.1),
        'fc_w':       w(ks[6], (C, 4 * C)),
        'fc_b':       w(ks[7], (1, 4 * C)),
        'mlp_proj_w': w(ks[8], (4 * C, C)),
        'mlp_proj_b': w(ks[9], (1, C)),
        'ln2_g':      (1.0 + 0.1 * jax.random.normal(ks[10], (1, C))).astype(jnp.float32),
        'ln2_b':      w(ks[11], (1, C), std=0.1),
    }

    x = jax.random.normal(ks[12], (B, S, C), jnp.float32)
    # additive attention mask, shape (B, 1, S): 0 = attend, -10000 = masked
    keep = (jax.random.uniform(ks[13], (B, 1, S)) > 0.2).astype(jnp.float32)
    keep = keep.at[:, :, 0].set(1.0)  # each row always sees at least column 0
    attention_mask = (1.0 - keep) * -10000.0

    ref = gpt_block_ref(x, attention_mask, params, n_head=NH, eps=EPS)

    # f32 matmul path with 8-wide tiles: exercises the multi-tile online
    # softmax and the causal KV-tile skip; tight semantic check.
    out_f32 = jax.block_until_ready(
        gpt_block(x, attention_mask, params, n_head=NH, eps=EPS,
                  compute_dtype=jnp.float32, out_dtype=jnp.float32,
                  q_tile=8, kv_tile=8, proj_tile=8))
    assert out_f32.shape == (B, S, C)
    err32 = jnp.max(jnp.abs(out_f32 - ref))
    assert jnp.allclose(out_f32, ref, atol=1e-4, rtol=1e-4), \
        f"f32 max diff {err32}"

    # bf16 MXU-operand path with bf16 output (production config).  The f32
    # path above is the tight semantic check; this tolerance only covers
    # bf16 rounding of operands/outputs.
    out_bf16 = jax.block_until_ready(
        gpt_block(x, attention_mask, params, n_head=NH, eps=EPS,
                  compute_dtype=jnp.bfloat16, out_dtype=jnp.bfloat16,
                  q_tile=8, kv_tile=8, proj_tile=8))
    assert out_bf16.shape == (B, S, C) and out_bf16.dtype == jnp.bfloat16
    err16 = jnp.max(jnp.abs(out_bf16.astype(jnp.float32) - ref))
    assert jnp.allclose(out_bf16.astype(jnp.float32), ref, atol=1e-1, rtol=1e-1), \
        f"bf16 max diff {err16}"

    print("KERNEL_OK")
</pallas_src>

<mosaic_0001>
module attributes {stable_mosaic.version = 11 : i64} {
  func.func @qkv_proj_kernel(%arg0: i32, %arg1: i32, %arg2: memref<1x8x32xf32, #tpu.memory_space<vmem>>, %arg3: memref<32x96xf32, #tpu.memory_space<vmem>>, %arg4: memref<1x96xf32, #tpu.memory_space<vmem>>, %arg5: memref<1x4x8x8xf32, #tpu.memory_space<vmem>>, %arg6: memref<1x4x8x8xf32, #tpu.memory_space<vmem>>, %arg7: memref<1x4x8x8xf32, #tpu.memory_space<vmem>>) attributes {dimension_semantics = [#tpu.dimension_semantics<parallel>, #tpu.dimension_semantics<parallel>], iteration_bounds = array<i64: 2, 2>, scalar_prefetch = 0 : i64, scratch_operands = 0 : i64, tpu.core_type = #tpu.core_type<tc>, window_params = [{transform_indices = @transform_0, window_bounds = array<i64: 1, 8, 32>}, {pipeline_mode = #tpu.pipeline_mode<synchronous>, transform_indices = @transform_1, window_bounds = array<i64: 32, 96>}, {pipeline_mode = #tpu.pipeline_mode<synchronous>, transform_indices = @transform_2, window_bounds = array<i64: 1, 96>}, {transform_indices = @transform_3, window_bounds = array<i64: 1, 4, 8, 8>}, {transform_indices = @transform_4, window_bounds = array<i64: 1, 4, 8, 8>}, {transform_indices = @transform_5, window_bounds = array<i64: 1, 4, 8, 8>}]} {
    %c0 = arith.constant 0 : index
    %c0_0 = arith.constant 0 : index
    %c0_1 = arith.constant 0 : index
    %0 = vector.load %arg2[%c0, %c0_0, %c0_1] : memref<1x8x32xf32, #tpu.memory_space<vmem>>, vector<1x8x32xf32>
    %1 = vector.shape_cast %0 : vector<1x8x32xf32> to vector<8x32xf32>
    %c0_2 = arith.constant 0 : index
    %c0_3 = arith.constant 0 : index
    %2 = vector.load %arg3[%c0_2, %c0_3] : memref<32x96xf32, #tpu.memory_space<vmem>>, vector<32x32xf32>
    %cst = arith.constant dense<0.000000e+00> : vector<8x32xf32>
    %3 = tpu.matmul %1, %2, %cst {dimension_numbers = #tpu.dot_dimension_numbers<[1], [0], [0], [1], [0, 0, 1, 1], [], []>} : vector<8x32xf32>, vector<32x32xf32>, vector<8x32xf32> -> vector<8x32xf32>
    %c0_4 = arith.constant 0 : index
    %c0_5 = arith.constant 0 : index
    %4 = vector.load %arg4[%c0_4, %c0_5] : memref<1x96xf32, #tpu.memory_space<vmem>>, vector<1x32xf32>
    %5 = vector.shape_cast %4 : vector<1x32xf32> to vector<32xf32>
    %6 = vector.shape_cast %5 : vector<32xf32> to vector<1x32xf32>
    %7 = vector.broadcast %6 : vector<1x32xf32> to vector<8x32xf32>
    %8 = arith.addf %3, %7 : vector<8x32xf32>
    %cst_6 = arith.constant 0.353553385 : f32
    %9 = vector.broadcast %cst_6 : f32 to vector<8x32xf32>
    %10 = arith.mulf %8, %9 : vector<8x32xf32>
    %11 = vector.shape_cast %10 : vector<8x32xf32> to vector<8x4x8xf32>
    %12 = tpu.transpose %11, [1, 0, 2] : vector<8x4x8xf32> -> vector<4x8x8xf32>
    %c0_7 = arith.constant 0 : index
    %c0_8 = arith.constant 0 : index
    %c0_9 = arith.constant 0 : index
    %c0_10 = arith.constant 0 : index
    %13 = vector.load %arg5[%c0_7, %c0_8, %c0_9, %c0_10] : memref<1x4x8x8xf32, #tpu.memory_space<vmem>>, vector<1x4x8x8xf32>
    %14 = vector.shape_cast %13 : vector<1x4x8x8xf32> to vector<4x8x8xf32>
    %15 = vector.shape_cast %12 : vector<4x8x8xf32> to vector<1x4x8x8xf32>
    tpu.vector_store %arg5[%c0_7, %c0_8, %c0_9, %c0_10], %15 {strides = array<i32>} : memref<1x4x8x8xf32, #tpu.memory_space<vmem>>, vector<1x4x8x8xf32>,
    %c0_11 = arith.constant 0 : index
    %c32 = arith.constant 32 : index
    %16 = vector.load %arg3[%c0_11, %c32] : memref<32x96xf32, #tpu.memory_space<vmem>>, vector<32x32xf32>
    %cst_12 = arith.constant dense<0.000000e+00> : vector<8x32xf32>
    %17 = tpu.matmul %1, %16, %cst_12 {dimension_numbers = #tpu.dot_dimension_numbers<[1], [0], [0], [1], [0, 0, 1, 1], [], []>} : vector<8x32xf32>, vector<32x32xf32>, vector<8x32xf32> -> vector<8x32xf32>
    %c0_13 = arith.constant 0 : index
    %c32_14 = arith.constant 32 : index
    %18 = vector.load %arg4[%c0_13, %c32_14] : memref<1x96xf32, #tpu.memory_space<vmem>>, vector<1x32xf32>
    %19 = vector.shape_cast %18 : vector<1x32xf32> to vector<32xf32>
    %20 = vector.shape_cast %19 : vector<32xf32> to vector<1x32xf32>
    %21 = vector.broadcast %20 : vector<1x32xf32> to vector<8x32xf32>
    %22 = arith.addf %17, %21 : vector<8x32xf32>
    %23 = vector.shape_cast %22 : vector<8x32xf32> to vector<8x4x8xf32>
    %24 = tpu.transpose %23, [1, 0, 2] : vector<8x4x8xf32> -> vector<4x8x8xf32>
    %c0_15 = arith.constant 0 : index
    %c0_16 = arith.constant 0 : index
    %c0_17 = arith.constant 0 : index
    %c0_18 = arith.constant 0 : index
    %25 = vector.load %arg6[%c0_15, %c0_16, %c0_17, %c0_18] : memref<1x4x8x8xf32, #tpu.memory_space<vmem>>, vector<1x4x8x8xf32>
    %26 = vector.shape_cast %25 : vector<1x4x8x8xf32> to vector<4x8x8xf32>
    %27 = vector.shape_cast %24 : vector<4x8x8xf32> to vector<1x4x8x8xf32>
    tpu.vector_store %arg6[%c0_15, %c0_16, %c0_17, %c0_18], %27 {strides = array<i32>} : memref<1x4x8x8xf32, #tpu.memory_space<vmem>>, vector<1x4x8x8xf32>,
    %c0_19 = arith.constant 0 : index
    %c64 = arith.constant 64 : index
    %28 = vector.load %arg3[%c0_19, %c64] : memref<32x96xf32, #tpu.memory_space<vmem>>, vector<32x32xf32>
    %cst_20 = arith.constant dense<0.000000e+00> : vector<8x32xf32>
    %29 = tpu.matmul %1, %28, %cst_20 {dimension_numbers = #tpu.dot_dimension_numbers<[1], [0], [0], [1], [0, 0, 1, 1], [], []>} : vector<8x32xf32>, vector<32x32xf32>, vector<8x32xf32> -> vector<8x32xf32>
    %c0_21 = arith.constant 0 : index
    %c64_22 = arith.constant 64 : index
    %30 = vector.load %arg4[%c0_21, %c64_22] : memref<1x96xf32, #tpu.memory_space<vmem>>, vector<1x32xf32>
    %31 = vector.shape_cast %30 : vector<1x32xf32> to vector<32xf32>
    %32 = vector.shape_cast %31 : vector<32xf32> to vector<1x32xf32>
    %33 = vector.broadcast %32 : vector<1x32xf32> to vector<8x32xf32>
    %34 = arith.addf %29, %33 : vector<8x32xf32>
    %35 = vector.shape_cast %34 : vector<8x32xf32> to vector<8x4x8xf32>
    %36 = tpu.transpose %35, [1, 0, 2] : vector<8x4x8xf32> -> vector<4x8x8xf32>
    %c0_23 = arith.constant 0 : index
    %c0_24 = arith.constant 0 : index
    %c0_25 = arith.constant 0 : index
    %c0_26 = arith.constant 0 : index
    %37 = vector.load %arg7[%c0_23, %c0_24, %c0_25, %c0_26] : memref<1x4x8x8xf32, #tpu.memory_space<vmem>>, vector<1x4x8x8xf32>
    %38 = vector.shape_cast %37 : vector<1x4x8x8xf32> to vector<4x8x8xf32>
    %39 = vector.shape_cast %36 : vector<4x8x8xf32> to vector<1x4x8x8xf32>
    tpu.vector_store %arg7[%c0_23, %c0_24, %c0_25, %c0_26], %39 {strides = array<i32>} : memref<1x4x8x8xf32, #tpu.memory_space<vmem>>, vector<1x4x8x8xf32>,
    return
  }
  func.func @transform_0(%arg0: i32, %arg1: i32) -> (i32, i32, i32) {
    %c0_i32 = arith.constant 0 : i32
    %c0_i32_0 = arith.constant 0 : i32
    return %arg0, %arg1, %c0_i32 : i32, i32, i32
  }
  func.func @transform_1(%arg0: i32, %arg1: i32) -> (i32, i32) {
    %c0_i32 = arith.constant 0 : i32
    %c0_i32_0 = arith.constant 0 : i32
    %c0_i32_1 = arith.constant 0 : i32
    return %c0_i32, %c0_i32_0 : i32, i32
  }
  func.func @transform_2(%arg0: i32, %arg1: i32) -> (i32, i32) {
    %c0_i32 = arith.constant 0 : i32
    %c0_i32_0 = arith.constant 0 : i32
    %c0_i32_1 = arith.constant 0 : i32
    return %c0_i32, %c0_i32_0 : i32, i32
  }
  func.func @transform_3(%arg0: i32, %arg1: i32) -> (i32, i32, i32, i32) {
    %c0_i32 = arith.constant 0 : i32
    %c0_i32_0 = arith.constant 0 : i32
    %c0_i32_1 = arith.constant 0 : i32
    return %arg0, %c0_i32, %arg1, %c0_i32_0 : i32, i32, i32, i32
  }
  func.func @transform_4(%arg0: i32, %arg1: i32) -> (i32, i32, i32, i32) {
    %c0_i32 = arith.constant 0 : i32
    %c0_i32_0 = arith.constant 0 : i32
    %c0_i32_1 = arith.constant 0 : i32
    return %arg0, %c0_i32, %arg1, %c0_i32_0 : i32, i32, i32, i32
  }
  func.func @transform_5(%arg0: i32, %arg1: i32) -> (i32, i32, i32, i32) {
    %c0_i32 = arith.constant 0 : i32
    %c0_i32_0 = arith.constant 0 : i32
    %c0_i32_1 = arith.constant 0 : i32
    return %arg0, %c0_i32, %arg1, %c0_i32_0 : i32, i32, i32, i32
  }
}

</mosaic_0001>

<bundles_post_ra>
// kernel: tpu_custom_call.1
= control target key start
LH: loop header
LB: loop body
LE: loop exit
PB: predicated region body
PF: predicated region fallthrough
CT: control target
= control target key end

     0   :  { %s1984_s0 = inlined_call_operand.hbm [shape: f32[2,16,32], index: 0, kind: input, shape index: {}]   ;;  %s1985_s1 = inlined_call_operand.hbm [shape: f32[32,96], index: 1, kind: input, shape index: {}]   ;;  %s1986_s2 = inlined_call_operand.vmem [shape: f32[1,96], index: 2, kind: input, shape index: {}]   ;;  %s1987_s3 = inlined_call_operand.vmem [shape: f32[2,4,16,8], index: 3, kind: output, shape index: {0}]   ;;  %s1988_s4 = inlined_call_operand.vmem [shape: f32[2,4,16,8], index: 4, kind: output, shape index: {1}]   ;;  %s1989_s5 = inlined_call_operand.vmem [shape: f32[2,4,16,8], index: 5, kind: output, shape index: {2}]  }
   0x1   :  { %1991 = sst [smem:[#allocation12_spill]] %s1985_s1 }
   0x2   :  { %1992 = sst [smem:[#allocation13_spill]] %s1987_s3 }
   0x3   :  { %1993 = sst [smem:[#allocation14_spill]] %s1988_s4 }
   0x4   :  { %1994 = sst [smem:[#allocation15_spill]] %s1989_s5 }
   0x5   :  { %11 = vsyncpa [#allocation3], 0 }
   0x6   :  { %13 = vsyncpa [#allocation3 + $0x1], 0 }
   0x7   :  { %14 = vsyncpa [#allocation5], 0  ;;  %s1684_s18 = smov 0   ;;  %s1686_s19 = smov 0  }
   0x8   :  { %s1688_s20 = smov 0   ;;  %s1690_s21 = smov 0  }
   0x9   :  { %s1692_s22 = smov 0   ;;  %s1694_s23 = smov 0  }
   0xa   :  { %s1696_s24 = smov 0   ;;  %s1698_s25 = smov 0  }
   0xb LB: > { %s1337_s26 = sadd.s32 4294967295, %s1639_s25   ;;  %p54_p0 = scmp.ne.s32.totalorder %s1615_s19, %s1611_s18  ;;  %s1639_s25 = sphi %s1698_s25, %s20_s25   ;;  %s1635_s24 = sphi %s1696_s24, %s2016_s24   ;;  %s1631_s23 = sphi %s1694_s23, %s2015_s23   ;;  %s1627_s22 = sphi %s1692_s22, %s2014_s22   ;;  %s1623_s21 = sphi %s1690_s21, %s2013_s21   ;;  %s1619_s20 = sphi %s1688_s20, %s2012_s20   ;;  %s1615_s19 = sphi %s1686_s19, %s2011_s19   ;;  %s1611_s18 = sphi %s1684_s18, %s2010_s18  }
   0xc   : > { %p1724_p1 = scmp.eq.s32.totalorder %s1337_s26, 0  ;;  %p1339_p2 = scmp.ge.s32.totalorder %s1639_s25, 1 }
   0xd   : > { %p191_p3 = scmp.lt.s32.totalorder %s1639_s25, 5  ;;  %s1641_s30 = smov [#allocation4]  }
   0xe   : > { %p1732_p4 = por %p1724_p1, %p54_p0  ;;  %s203_s6 = sshll.u32 %s1641_s30, 4  ;;  %s204_s6 = int_to_ptr.vmem [resolvable:$true] %s203_s6 }
   0xf   : > { %p1736_p5 = pnand %p1339_p2, %p191_p3  ;;  %s1526_s7 = scalar_lea.vmem %s204_s6, 512 }
  0x10   : > { %p1527_p9 = scmp.ne.s32.totalorder %s204_s6, %s1526_s7  ;;  %p1534_p12 = scmp.lt.s32.totalorder %s204_s6, %s204_s6 }
  0x11   : > { %p1428_p6 = pneg %p1736_p5  ;;  %p1535_p13 = scmp.lt.s32.totalorder %s1526_s7, %s1526_s7 }
  0x13   : > { %p1429_p7 = pnand %p1428_p6, %p1724_p1  ;;  %p1536_p0 = por %p1535_p13, %p1534_p12 }
  0x15   : > { %p1517_p8 = pneg %p1429_p7 }
  0x17   : > { %p1529_p10 = pnand %p1527_p9, %p1517_p8 }
  0x19   : > { %p1530_p11 = pneg %p1529_p10 }
  0x1b   : > { %p1537_p2 = pnand %p1536_p0, %p1530_p11 }
  0x1d   : > { %1540 = shalt.err (!%p1537_p2)
}
  0x1e   : > { %s1642_s8 = smov 128   ;;  %s1643_s9 = smov 8  }
  0x1f   : > { %s1998_s1 = sld [smem:[#allocation12_spill]]  ;;  %p122_p3 = scmp.eq.s32.totalorder %s1337_s26, 3 }
  0x20   : > { %s29_s12 = sadd.s32 1, %s1631_s23  ;;  %s32_s13 = sadd.s32 1, %s1635_s24 }
  0x21   : > { %p30_p6 = scmp.ge.s32.totalorder %s29_s12, 2  ;;  %p48_p8 = scmp.ne.s32.totalorder %s1619_s20, %s1615_s19 }
  0x22   : > { %p49_p9 = scmp.eq.s32.totalorder %s1639_s25, 0  ;;  %s41_s15 = sadd.s32 1, %s1619_s20 }
  0x23   : > { %s2018_s12 = smov (%p30_p6, %s29_s12), 0  ;;  %s2020_s13 = smov (!%p30_p6, %s32_s13), %s1635_s24 }
  0x24   : > { %1999 = sst [smem:[#allocation11_spill]] %s2018_s12  ;;  %s37_s14 = ssub.s32 %s1631_s23, %s2018_s12 }
  0x25   : > { %1431 = dma.hbm_to_vmem [thread:$0]  (!%p1429_p7), %s1998_s1, 512, %s204_s6, [#allocation5], %s1642_s8, %s1642_s8, %s1643_s9  }
  0x26   : > { %p34_p10 = scmp.ge.s32.totalorder %s2020_s13, 2  ;;  %p1758_p11 = por %p122_p3, %p48_p8 }
  0x27   : > { %p1762_p7 = por %p49_p9, %p48_p8  ;;  %s220_s18 = sand.u32 1, %s1619_s20  }
  0x28   : > { %s2000_s16 = scalar_select %p1758_p11, 1, 0 }
  0x29   : > { %s2022_s13 = smov (%p34_p10, %s2020_s13), 0  ;;  %p1437_p12 = scmp.lt.s32.totalorder %s1639_s25, 4 }
  0x2a   : > { %s1342_s26 = sshll.u32 %s220_s18, 3  ;;  %s36_s30 = ssub.s32 %s1635_s24, %s2022_s13 }
  0x2b   : > { %s38_s6 = sor.u32 %s37_s14, %s36_s30  ;;  %s1343_s7 = sshll.u32 %s1635_s24, 1 }
  0x2c   : > { %p39_p13 = scmp.eq.s32.totalorder %s38_s6, 0  ;;  %s229_s8 = sadd.s32 %s1631_s23, %s1343_s7 }
  0x2d   : > { %s1344_s9 = sshll.u32 %s229_s8, 7  ;;  %s224_s10 = scalar_lea.vmem [#allocation2], %s1342_s26 }
  0x2e   : > { %s233_s11 = sshll.u32 %s224_s10, 4  ;;  %s231_s4 = scalar_lea.hbm %s1984_s0, %s1344_s9  ;;  %s234_s11 = int_to_ptr.vmem [resolvable:$true] %s233_s11 }
  0x2f   : > { %s1775_s1 = scalar_select %p39_p13, %s1619_s20, %s41_s15  }
  0x30   : > { %p1784_p0 = pnand %p1437_p12, %p1762_p7  ;;  %s221_s14 = scalar_lea.sflag [#allocation3], %s220_s18 }
  0x31   : > { %s1554_s30 = scalar_lea.vmem %s234_s11, 128  ;;  %s1644_s15 = smov [#allocation2]  }
  0x32   : > { %p1543_p2 = pneg %p1784_p0  ;;  %p1555_p3 = scmp.ne.s32.totalorder %s234_s11, %s1554_s30 }
  0x33   : > { %s1559_s26 = sshll.u32 %s1644_s15, 4  ;;  %s1560_s26 = int_to_ptr.vmem [resolvable:$false] %s1559_s26 }
  0x34   : > { %p1557_p6 = pnand %p1555_p3, %p1543_p2  ;;  %s1561_s5 = scalar_lea.vmem %s1560_s26, 256 }
  0x35   : > { %p1562_p9 = scmp.lt.s32.totalorder %s234_s11, %s1560_s26  ;;  %p1563_p10 = scmp.lt.s32.totalorder %s1561_s5, %s1554_s30 }
  0x36   : > { %p1558_p8 = pneg %p1557_p6 }
  0x37   : > { %p1564_p13 = por %p1563_p10, %p1562_p9 }
  0x39   : > { %p1565_p11 = pnand %p1564_p13, %p1558_p8 }
  0x3b   : > { %1568 = shalt.err (!%p1565_p11)
}
  0x3c   : > { %1435 = dma.hbm_to_vmem [thread:$0]  (!%p1784_p0), %s231_s4, 128, %s234_s11, %s221_s14  }
  0x3d   : > { %242 = sbr.rel (%p1736_p5) target bundleno = 559 (0x22f), region = 32  ;;  %s1795_s12 = sand.u32 (!%p1736_p5), 1, %s1615_s19  }
  0x3e   : > { %s1346_s17 = sshll.u32 (!%p1736_p5), %s1795_s12, 3  ;;  %s245_s18 = scalar_lea.sflag (!%p1736_p5), [#allocation3], %s1795_s12 }
  0x3f   : > { %s248_s6 = scalar_lea.vmem (!%p1736_p5), [#allocation2], %s1346_s17 }
  0x42   : > { %1602 = dma.done.wait (%p1732_p4), %s245_s18, 128  }
  0x43   : > { %1604 = vsyncadd (%p1732_p4), %s245_s18, 4294967168 }
  0x44   : > { %1606 = dma.done.wait (%p1724_p1), [#allocation5], 512  }
  0x45   : > { %1608 = vsyncadd (%p1724_p1), [#allocation5], 4294966784  ;;  %v1645_v0 = vmov 0.0   ;;  %vm1646_vm0 = vmmov 0   ;;  %v527_v1 = vld [vmem:[#allocation4 + $0x18] sm:$0xff]  ;;  %v526_v2 = vld [vmem:[#allocation4 + $0x10] sm:$0xff]  ;;  %v388_v23 = vlaneseq }
  0x46   : > { %1389 = vmatprep.subr.mxu0 %v1645_v0  ;;  %1397 = vmatprep.mubr.msk.f32.mxu0 %vm1646_vm0, %v1645_v0  ;;  %s1647_s3 = smov 96   ;;  %v288_v3 = vld [vmem:[#allocation4 + $0x8] sm:$0xff]  ;;  %v287_v4 = vld [vmem:[#allocation4] sm:$0xff]  ;;  %s1648_s4 = smov 64   ;;  %v286_v5 = vld [vmem:[%s248_s6] sm:$0xff]  ;;  %vm298_vm1 = vcmask 261120  }
  0x47   : > { %1400 = vmatprep.subr.mxu1 %v1645_v0  ;;  %1408 = vmatprep.mubr.msk.f32.mxu1 %vm1646_vm0, %v1645_v0  ;;  %v1351_v6 = vld [vmem:[%s1986_s2] ss:$0 sm:$0xff]  ;;  %s1649_s29 = smov 112   ;;  %s1650_s7 = smov 120   ;;  %v1652_v21 = vmov 1983009808  }
  0x48   : > { %544 = vrot.lane.b32.xlu0 %v527_v1, %s1647_s3  ;;  %1390 = vmatpush3.msra.mxu0 %v527_v1  ;;  %s1651_s8 = smov 104   ;;  %v386_v22 = vunpack.c.l.s4 %v1652_v21  ;;  %v1653_v24 = vmov 1934713408   ;;  %v389_v27 = vshrl.u32 %v388_v23, 7  ;;  %s1852_s9 = sshll.u32 %s1795_s12, 5  ;;  %vm519_vm2 = vcmask 64512  }
  0x49   : > { %1391 = vmatprep.subr.mxu0 %v1645_v0  ;;  %542 = vrot.lane.b32.xlu1 %v526_v2, %s1647_s3  ;;  %v418_v25 = vunpack.c.l.s4 %v1653_v24  ;;  %s1859_s10 = scalar_lea.vmem [#allocation6], %s1852_s9  ;;  %s1902_s11 = scalar_lea.vmem [#allocation7], %s1852_s9 }
  0x4a   : > { %1392 = vmatpush3.msra.mxu0 %v526_v2  ;;  %v387_v26 = vunpack.c.0.s8 %v386_v22  ;;  %s1917_s14 = scalar_lea.vmem [#allocation8], %s1852_s9  ;;  %p2003_p1 = scmp.ne.s32.totalorder %s2000_s16, 0 }
  0x4b   : > { %1393 = vmatprep.subr.mxu0 %v1645_v0  ;;  %v419_v31 = vunpack.c.0.s8 %v418_v25  ;;  %s1366_s30 = sshll.u32 (%p2003_p1), %s1627_s22, 3  ;;  %s2004_s17 = sld [smem:[#allocation13_spill]] (%p2003_p1) }
  0x4c   : > { %793 = vrot.lane.b32.xlu0 %v527_v1, %s1648_s4  ;;  %1394 = vmatpush3.msra.mxu0 %v288_v3  ;;  %v1819_v32 = vsub.s32 %v387_v26, %v389_v27  ;;  %s1038_s15 = sadd.s32 (%p2003_p1), %s1623_s21, %s1366_s30 }
  0x4d   : > { %1395 = vmatprep.subr.mxu0 %v1645_v0  ;;  %791 = vrot.lane.b32.xlu1 %v526_v2, %s1648_s4  ;;  %v1827_v42 = vsub.s32 %v419_v31, %v389_v27  ;;  %s1367_s26 = sshll.u32 (%p2003_p1), %s1038_s15, 3 }
  0x4e   : > { %1396 = vmatpush3.msra.mxu0 %v287_v4 }
  0x4f   : > { %1398 = vmatmul.mubr.msk.f32.vlgmr.msra.gmra.mxu0 %vm298_vm1, %v286_v5  ;;  %1411 = vmatprep.subr.mxu0 %v1645_v0 }
  0x50   : > { %540 = vrot.lane.b32.xlu0 %v288_v3, %s1647_s3  ;;  %1419 = vmatprep.mubr.msk.f32.mxu0 %vm1646_vm0, %v1645_v0 }
  0x51   : > { %789 = vrot.lane.b32.xlu1 %v288_v3, %s1648_s4  ;;  %s1040_s18 = scalar_lea.vmem (%p2003_p1), %s2004_s17, %s1367_s26 }
  0x54   : > { %538 = vrot.lane.b32.xlu0 %v287_v4, %s1647_s3 }
  0x55   : > { %787 = vrot.lane.b32.xlu1 %v287_v4, %s1648_s4 }
  0x58   : > { %550 = vrot.lane.b32.xlu0 %v1351_v6, %s1647_s3 }
  0x59   : > { %799 = vrot.lane.b32.xlu1 %v1351_v6, %s1648_s4 }
  0xba   : > { %v545_v7 = vpop.permute.xlu0 %544 }
  0xbb   : > { %1401 = vmatpush3.msra.mxu1 %v545_v7  ;;  %v543_v8 = vpop.permute.xlu1 %542 }
  0xbc   : > { %1402 = vmatprep.subr.mxu1 %v1645_v0 }
  0xbd   : > { %1403 = vmatpush3.msra.mxu1 %v543_v8 }
  0xbe   : > { %v794_v9 = vpop.permute.xlu0 %793  ;;  %1404 = vmatprep.subr.mxu1 %v1645_v0 }
  0xbf   : > { %1412 = vmatpush3.msra.mxu0 %v794_v9  ;;  %v792_v10 = vpop.permute.xlu1 %791 }
  0xc0   : > { %1413 = vmatprep.subr.mxu0 %v1645_v0 }
  0xc1   : > { %1414 = vmatpush3.msra.mxu0 %v792_v10 }
  0xc2   : > { %v541_v11 = vpop.permute.xlu0 %540  ;;  %1415 = vmatprep.subr.mxu0 %v1645_v0 }
  0xc3   : > { %1405 = vmatpush3.msra.mxu1 %v541_v11  ;;  %v790_v12 = vpop.permute.xlu1 %789 }
  0xc4   : > { %1406 = vmatprep.subr.mxu1 %v1645_v0  ;;  %1416 = vmatpush3.msra.mxu0 %v790_v12 }
  0xc5   : > { %1417 = vmatprep.subr.mxu0 %v1645_v0 }
  0xc6   : > { %v539_v13 = vpop.permute.xlu0 %538 }
  0xc7   : > { %1407 = vmatpush3.msra.mxu1 %v539_v13  ;;  %v788_v14 = vpop.permute.xlu1 %787 }
  0xc8   : > { %1409 = vmatmul.mubr.msk.f32.vlgmr.msra.gmra.mxu1 %vm298_vm1, %v286_v5  ;;  %1418 = vmatpush3.msra.mxu0 %v788_v14 }
  0xc9   : > { %1420 = vmatmul.mubr.msk.f32.vlgmr.msra.gmra.mxu0 %vm298_vm1, %v286_v5 }
  0xca   : > { %v551_v20 = vpop.permute.xlu0 %550 }
  0xcb   : > { %v800_v19 = vpop.permute.xlu1 %799 }
 0x10f   : > { %v368_v15 = vpop.f32.mrf.mxu0 }
 0x110   : > { %v369_v16 = vadd.f32 %v1351_v6, %v368_v15 }
 0x111   : > { %v1399_v17 = vpop.f32.mrf.mxu0 }
 0x112   : > { %v372_v18 = vmul.f32 0.35355338, %v369_v16 }
 0x114   : > { %377 = vrot.lane.b32.xlu1 %v372_v18, %s1649_s29  ;;  %374 = vrot.lane.b32.xlu0 %v372_v18, %s1650_s7 }
 0x118   : > { %380 = vrot.lane.b32.xlu0 %v372_v18, %s1651_s8 }
 0x186   : > { %v378_v28 = vpop.permute.xlu1 %377  ;;  %v375_v29 = vpop.permute.xlu0 %374 }
 0x187   : > { %v383_v33 = vcombine.low %v372_v18, %v378_v28  ;;  %v384_v34 = vcombine.high %v372_v18, %v378_v28 }
 0x188   : > { %v619_v30 = vpop.f32.mrf.mxu1 }
 0x189   : > { %v1821_v35 = vadd.f32 %v619_v30, %v551_v20  ;;  %v868_v36 = vpop.f32.mrf.mxu0  ;;  %v391_v44 = vrot.slane %v383_v33, %v1819_v32  ;;  %v398_v45 = vrot.slane %v384_v34, %v1819_v32 }
 0x18a   : > { %v1410_v37 = vpop.f32.mrf.mxu1  ;;  %v381_v38 = vpop.permute.xlu0 %380  ;;  %v1829_v43 = vadd.f32 %v868_v36, %v800_v19 }
 0x18b   : > { %v399_v39 = vcombine.low %v375_v29, %v381_v38  ;;  %v400_v40 = vcombine.high %v375_v29, %v381_v38  ;;  %624 = vrot.lane.b32.xlu1 %v1821_v35, %s1650_s7  ;;  %627 = vrot.lane.b32.xlu0 %v1821_v35, %s1649_s29  ;;  %v1421_v41 = vpop.f32.mrf.mxu0 }
 0x18d   : > { %v407_v46 = vrot.slane %v399_v39, %v1819_v32  ;;  %v414_v47 = vrot.slane %v400_v40, %v1819_v32 }
 0x18f   : > { %v415_v48 = vcombine.low %v391_v44, %v407_v46  ;;  %v416_v49 = vcombine.high %v391_v44, %v407_v46  ;;  %v431_v50 = vcombine.low %v398_v45, %v414_v47  ;;  %v432_v51 = vcombine.high %v398_v45, %v414_v47  ;;  %630 = vrot.lane.b32.xlu1 %v1821_v35, %s1651_s8 }
 0x190   : > { %873 = vrot.lane.b32.xlu0 %v1829_v43, %s1650_s7 }
 0x191   : > { %v423_v52 = vrot.slane %v415_v48, %v1827_v42  ;;  %v430_v53 = vrot.slane %v416_v49, %v1827_v42  ;;  %v439_v54 = vrot.slane %v431_v50, %v1827_v42  ;;  %v446_v55 = vrot.slane %v432_v51, %v1827_v42 }
 0x193   : > { %v451_v56 = vcombine.low %v423_v52, %v430_v53  ;;  %v1353_v57 = vcombine.high %v423_v52, %v430_v53  ;;  %v467_v58 = vcombine.low %v439_v54, %v446_v55  ;;  %v1354_v59 = vcombine.high %v439_v54, %v446_v55  ;;  %876 = vrot.lane.b32.xlu1 %v1829_v43, %s1649_s29 }
 0x194   : > { %879 = vrot.lane.b32.xlu0 %v1829_v43, %s1651_s8 }
 0x195   : > { %v458_v60 = vrot.slane %v451_v56, %v1819_v32  ;;  %v466_v61 = vrot.slane %v1353_v57, %v1819_v32  ;;  %v474_v62 = vrot.slane %v467_v58, %v1819_v32  ;;  %v482_v63 = vrot.slane %v1354_v59, %v1819_v32 }
 0x197   : > { %v483_v0 = vcombine.low %v458_v60, %v466_v61  ;;  %v484_v1 = vcombine.high %v458_v60, %v466_v61  ;;  %v499_v2 = vcombine.low %v474_v62, %v482_v63  ;;  %v500_v3 = vcombine.high %v474_v62, %v482_v63 }
 0x199   : > { %v491_v4 = vrot.slane %v483_v0, %v1827_v42  ;;  %v498_v5 = vrot.slane %v484_v1, %v1827_v42  ;;  %v507_v6 = vrot.slane %v499_v2, %v1827_v42  ;;  %v514_v7 = vrot.slane %v500_v3, %v1827_v42 }
 0x19b   : > { %v515_v8 = vcombine.low %v491_v4, %v507_v6  ;;  %v516_v9 = vcombine.high %v491_v4, %v507_v6  ;;  %v517_v10 = vcombine.low %v498_v5, %v514_v7  ;;  %v518_v11 = vcombine.high %v498_v5, %v514_v7 }
 0x19d   : > { %520 = vst.msk [vmem:[%s1859_s10] sm:$0xff] %vm519_vm2, %v515_v8  ;;  %521 = vst.msk [vmem:[%s1859_s10 + $0x8] sm:$0xff] %vm519_vm2, %v516_v9 }
 0x19e   : > { %522 = vst.msk [vmem:[%s1859_s10 + $0x10] sm:$0xff] %vm519_vm2, %v517_v10  ;;  %523 = vst.msk [vmem:[%s1859_s10 + $0x18] sm:$0xff] %vm519_vm2, %v518_v11 }
 0x1fd   : > { %v625_v12 = vpop.permute.xlu1 %624  ;;  %v628_v13 = vpop.permute.xlu0 %627 }
 0x1fe   : > { %v633_v14 = vcombine.low %v1821_v35, %v628_v13  ;;  %v634_v15 = vcombine.high %v1821_v35, %v628_v13 }
 0x200   : > { %v641_v20 = vrot.slane %v633_v14, %v1819_v32  ;;  %v648_v21 = vrot.slane %v634_v15, %v1819_v32 }
 0x201   : > { %v631_v16 = vpop.permute.xlu1 %630 }
 0x202   : > { %v649_v17 = vcombine.low %v625_v12, %v631_v16  ;;  %v650_v18 = vcombine.high %v625_v12, %v631_v16  ;;  %v874_v19 = vpop.permute.xlu0 %873 }
 0x204   : > { %v657_v22 = vrot.slane %v649_v17, %v1819_v32  ;;  %v664_v23 = vrot.slane %v650_v18, %v1819_v32 }
 0x205   : > { %v877_v24 = vpop.permute.xlu1 %876 }
 0x206   : > { %v665_v25 = vcombine.low %v641_v20, %v657_v22  ;;  %v666_v26 = vcombine.high %v641_v20, %v657_v22  ;;  %v681_v27 = vcombine.low %v648_v21, %v664_v23  ;;  %v682_v28 = vcombine.high %v648_v21, %v664_v23  ;;  %v880_v29 = vpop.permute.xlu0 %879 }
 0x207   : > { %v882_v30 = vcombine.low %v1829_v43, %v877_v24  ;;  %v883_v31 = vcombine.high %v1829_v43, %v877_v24  ;;  %v898_v33 = vcombine.low %v874_v19, %v880_v29  ;;  %v899_v34 = vcombine.high %v874_v19, %v880_v29  ;;  %v1081_v29 = vld [vmem:[%s1859_s10 + $0x18] sm:$0xff] (%p2003_p1) }
 0x208   : > { %v673_v35 = vrot.slane %v665_v25, %v1827_v42  ;;  %v680_v36 = vrot.slane %v666_v26, %v1827_v42  ;;  %v689_v37 = vrot.slane %v681_v27, %v1827_v42  ;;  %v696_v38 = vrot.slane %v682_v28, %v1827_v42  ;;  %v1077_v27 = vld [vmem:[%s1859_s10 + $0x8] sm:$0xff] (%p2003_p1)  ;;  %v1079_v28 = vld [vmem:[%s1859_s10 + $0x10] sm:$0xff] (%p2003_p1)  ;;  %1082 = vst [vmem:[%s1040_s18 + $0x30] sm:$0xff] (%p2003_p1), %v1081_v29 }
 0x209   : > { %v890_v39 = vrot.slane %v882_v30, %v1819_v32  ;;  %v897_v40 = vrot.slane %v883_v31, %v1819_v32  ;;  %v906_v41 = vrot.slane %v898_v33, %v1819_v32  ;;  %v913_v44 = vrot.slane %v899_v34, %v1819_v32  ;;  %1078 = vst [vmem:[%s1040_s18 + $0x10] sm:$0xff] (%p2003_p1), %v1077_v27 }
 0x20a   : > { %v701_v45 = vcombine.low %v673_v35, %v680_v36  ;;  %v1357_v43 = vcombine.high %v673_v35, %v680_v36  ;;  %v717_v46 = vcombine.low %v689_v37, %v696_v38  ;;  %v1358_v47 = vcombine.high %v689_v37, %v696_v38  ;;  %1080 = vst [vmem:[%s1040_s18 + $0x20] sm:$0xff] (%p2003_p1), %v1079_v28 }
 0x20b   : > { %v914_v48 = vcombine.low %v890_v39, %v906_v41  ;;  %v915_v49 = vcombine.high %v890_v39, %v906_v41  ;;  %v930_v50 = vcombine.low %v897_v40, %v913_v44  ;;  %v931_v51 = vcombine.high %v897_v40, %v913_v44 }
 0x20c   : > { %v708_v52 = vrot.slane %v701_v45, %v1819_v32  ;;  %v716_v53 = vrot.slane %v1357_v43, %v1819_v32  ;;  %v724_v54 = vrot.slane %v717_v46, %v1819_v32  ;;  %v732_v55 = vrot.slane %v1358_v47, %v1819_v32 }
 0x20d   : > { %v922_v56 = vrot.slane %v914_v48, %v1827_v42  ;;  %v929_v57 = vrot.slane %v915_v49, %v1827_v42  ;;  %v938_v58 = vrot.slane %v930_v50, %v1827_v42  ;;  %v945_v59 = vrot.slane %v931_v51, %v1827_v42 }
 0x20e   : > { %v733_v60 = vcombine.low %v708_v52, %v716_v53  ;;  %v734_v61 = vcombine.high %v708_v52, %v716_v53  ;;  %v749_v62 = vcombine.low %v724_v54, %v732_v55  ;;  %v750_v63 = vcombine.high %v724_v54, %v732_v55 }
 0x20f   : > { %v950_v0 = vcombine.low %v922_v56, %v929_v57  ;;  %v1361_v1 = vcombine.high %v922_v56, %v929_v57  ;;  %v966_v2 = vcombine.low %v938_v58, %v945_v59  ;;  %v1362_v3 = vcombine.high %v938_v58, %v945_v59 }
 0x210   : > { %v741_v4 = vrot.slane %v733_v60, %v1827_v42  ;;  %v748_v5 = vrot.slane %v734_v61, %v1827_v42  ;;  %v757_v6 = vrot.slane %v749_v62, %v1827_v42  ;;  %v764_v7 = vrot.slane %v750_v63, %v1827_v42 }
 0x211   : > { %v957_v8 = vrot.slane %v950_v0, %v1819_v32  ;;  %v965_v9 = vrot.slane %v1361_v1, %v1819_v32  ;;  %v973_v10 = vrot.slane %v966_v2, %v1819_v32  ;;  %v981_v11 = vrot.slane %v1362_v3, %v1819_v32 }
 0x212   : > { %v765_v12 = vcombine.low %v741_v4, %v757_v6  ;;  %v766_v13 = vcombine.high %v741_v4, %v757_v6  ;;  %v767_v14 = vcombine.low %v748_v5, %v764_v7  ;;  %v768_v15 = vcombine.high %v748_v5, %v764_v7 }
 0x213   : > { %v982_v16 = vcombine.low %v957_v8, %v965_v9  ;;  %v983_v17 = vcombine.high %v957_v8, %v965_v9  ;;  %v998_v18 = vcombine.low %v973_v10, %v981_v11  ;;  %v999_v19 = vcombine.high %v973_v10, %v981_v11 }
 0x214   : > { %769 = vst.msk [vmem:[%s1902_s11] sm:$0xff] %vm519_vm2, %v765_v12  ;;  %770 = vst.msk [vmem:[%s1902_s11 + $0x8] sm:$0xff] %vm519_vm2, %v766_v13 }
 0x215   : > { %771 = vst.msk [vmem:[%s1902_s11 + $0x10] sm:$0xff] %vm519_vm2, %v767_v14  ;;  %772 = vst.msk [vmem:[%s1902_s11 + $0x18] sm:$0xff] %vm519_vm2, %v768_v15  ;;  %v990_v32 = vrot.slane %v982_v16, %v1827_v42  ;;  %v997_v20 = vrot.slane %v983_v17, %v1827_v42  ;;  %v1006_v21 = vrot.slane %v998_v18, %v1827_v42 }
 0x216   : > { %v1013_v22 = vrot.slane %v999_v19, %v1827_v42  ;;  %1036 = sbr.rel (!%p2003_p1) target bundleno = 539 (0x21b), region = 44  ;;  %v1075_v42 = vld [vmem:[%s1859_s10] sm:$0xff] (%p2003_p1) }
 0x217   : > { %v1014_v23 = vcombine.low %v990_v32, %v1006_v21  ;;  %v1015_v24 = vcombine.high %v990_v32, %v1006_v21  ;;  %1076 = vst [vmem:[%s1040_s18] sm:$0xff] (%p2003_p1), %v1075_v42 }
 0x218   : > { %v1016_v25 = vcombine.low %v997_v20, %v1013_v22  ;;  %v1017_v26 = vcombine.high %v997_v20, %v1013_v22 }
 0x219   : > { %1018 = vst.msk [vmem:[%s1917_s14] sm:$0xff] %vm519_vm2, %v1014_v23  ;;  %1019 = vst.msk [vmem:[%s1917_s14 + $0x8] sm:$0xff] %vm519_vm2, %v1015_v24 }
 0x21a   : > { %1020 = vst.msk [vmem:[%s1917_s14 + $0x10] sm:$0xff] %vm519_vm2, %v1016_v25  ;;  %1021 = vst.msk [vmem:[%s1917_s14 + $0x18] sm:$0xff] %vm519_vm2, %v1017_v26 }
 0x21b PF: > { %p2005_p4 = scmp.ne.s32.totalorder %s2000_s16, 0 }
 0x21c   : > { %s1368_s6 = sshll.u32 (%p2005_p4), %s1627_s22, 3  ;;  %v1127_v30 = vld [vmem:[%s1902_s11] sm:$0xff] (%p2005_p4)  ;;  %v1129_v31 = vld [vmem:[%s1902_s11 + $0x8] sm:$0xff] (%p2005_p4)  ;;  %v1131_v33 = vld [vmem:[%s1902_s11 + $0x10] sm:$0xff] (%p2005_p4)  ;;  %s2006_s29 = sld [smem:[#allocation14_spill]] (%p2005_p4) }
 0x21d   : > { %1088 = sbr.rel (!%p2005_p4) target bundleno = 549 (0x225), region = 82  ;;  %s1090_s3 = sadd.s32 (%p2005_p4), %s1623_s21, %s1368_s6  ;;  %v1133_v34 = vld [vmem:[%s1902_s11 + $0x18] sm:$0xff] (%p2005_p4) }
 0x21e   : > { %s1369_s4 = sshll.u32 (%p2005_p4), %s1090_s3, 3 }
 0x222   : > { %s1092_s7 = scalar_lea.vmem %s2006_s29, %s1369_s4 }
 0x223   : > { %1128 = vst [vmem:[%s1092_s7] sm:$0xff] %v1127_v30  ;;  %1130 = vst [vmem:[%s1092_s7 + $0x10] sm:$0xff] %v1129_v31 }
 0x224   : > { %1132 = vst [vmem:[%s1092_s7 + $0x20] sm:$0xff] %v1131_v33  ;;  %1134 = vst [vmem:[%s1092_s7 + $0x30] sm:$0xff] %v1133_v34 }
 0x225 PF: > { %p2007_p5 = scmp.ne.s32.totalorder %s2000_s16, 0 }
 0x226   : > { %s1370_s8 = sshll.u32 (%p2007_p5), %s1627_s22, 3  ;;  %v1179_v35 = vld [vmem:[%s1917_s14] sm:$0xff] (%p2007_p5)  ;;  %v1181_v36 = vld [vmem:[%s1917_s14 + $0x8] sm:$0xff] (%p2007_p5)  ;;  %v1183_v37 = vld [vmem:[%s1917_s14 + $0x10] sm:$0xff] (%p2007_p5)  ;;  %s2008_s15 = sld [smem:[#allocation15_spill]] (%p2007_p5) }
 0x227   : > { %1140 = sbr.rel (!%p2007_p5) target bundleno = 559 (0x22f), region = 120  ;;  %s1142_s9 = sadd.s32 (%p2007_p5), %s1623_s21, %s1370_s8  ;;  %v1185_v38 = vld [vmem:[%s1917_s14 + $0x18] sm:$0xff] (%p2007_p5) }
 0x228   : > { %s1371_s10 = sshll.u32 (%p2007_p5), %s1142_s9, 3 }
 0x22c   : > { %s1144_s26 = scalar_lea.vmem %s2008_s15, %s1371_s10 }
 0x22d   : > { %1180 = vst [vmem:[%s1144_s26] sm:$0xff] %v1179_v35  ;;  %1182 = vst [vmem:[%s1144_s26 + $0x10] sm:$0xff] %v1181_v36 }
 0x22e   : > { %1184 = vst [vmem:[%s1144_s26 + $0x20] sm:$0xff] %v1183_v37  ;;  %1186 = vst [vmem:[%s1144_s26 + $0x30] sm:$0xff] %v1185_v38 }
 0x22f PF: > { %s20_s25 = sadd.s32 1, %s1639_s25   ;;  %s2009_s16 = sld [smem:[#allocation11_spill]] }
 0x230   : > { %p17_p11 = scmp.ge.s32.totalorder %s20_s25, 6   ;;  %s2010_s18 = smov %s1615_s19 }
 0x231   : > { %s2011_s19 = smov %s1619_s20  ;;  %s2012_s20 = smov %s1775_s1 }
 0x232   : > { %s2013_s21 = smov %s1631_s23  ;;  %s2014_s22 = smov %s1635_s24 }
 0x233   : > { %s2016_s24 = smov %s2022_s13  ;;  %19 = sbr.rel (!%p17_p11) target bundleno = 11 (0xb), region = 214 }
 0x235   : > { %s2015_s23 = smov %s2009_s16 }
 0x238   :  { %1216 = vsyncpa [#allocation3], 1 }
 0x239   :  { %1218 = vsyncpa [#allocation3 + $0x1], 1 }
 0x23a   :  { %1219 = vsyncpa [#allocation5], 1 }

</bundles_post_ra>
